<compile_context>
chip_gen: v7x
topology: tpu7x:2x2x1
jax: 0.10.0
libtpu: 0.0.40
codegen_flags: <defaults>
</compile_context>

<pallas_src>
import numpy as np
import jax
import jax.numpy as jnp
from jax.experimental import pallas as pl
from jax.experimental.pallas import tpu as pltpu


def _round_up(x, m):
    return ((x + m - 1) // m) * m


def _mlpbase_fused_kernel(xc_ref, w1_ref, b1_ref, w2_ref, b2_ref,
                          wout_ref, bout_ref, out_ref):
    """One row-tile of the fused MLPBase forward.

    xc_ref  : [TM, C+N]  rows of cat([condition_state, x], -1)
    w1_ref  : [C+N, 2H]  fused layer-1 (cols 0:H -> actor, H:2H -> critic)
    w2_ref  : [2H, 2H]   block-diag layer-2 = diag(Wa2, Wc2)
    wout_ref: [2H, 2H]   [:H,:H]=I (actor passthrough), [H:, H]=wv (value head)
    out_ref : [TM, 2H]   lanes 0:H = hidden_actor, lane H = value
    """
    xc = xc_ref[...].astype(jnp.float32)
    h1 = jnp.tanh(
        jnp.dot(xc, w1_ref[...], preferred_element_type=jnp.float32) + b1_ref[...]
    )
    h2 = jnp.tanh(
        jnp.dot(h1, w2_ref[...], preferred_element_type=jnp.float32) + b2_ref[...]
    )
    out = jnp.dot(h2, wout_ref[...], preferred_element_type=jnp.float32) + bout_ref[...]
    out_ref[...] = out.astype(out_ref.dtype)


def mlpbase_forward(inputs, rnn_hxs, condition_state, fused,
                    *, io_dtype=jnp.float32, row_tile=512):
    """inputs [S,B,N], rnn_hxs [B,H], condition_state [S,B,C]
       -> (value [S,B,1], hidden_actor [S,B,H], rnn_hxs)."""
    S, B, N = inputs.shape
    C = condition_state.shape[-1]
    H = fused["H"]
    Kin = C + N
    M = S * B

    # pre-concatenate once in the wrapper; the kernel sees a single slab
    xc = jnp.concatenate(
        [condition_state.reshape(M, C).astype(io_dtype),
         inputs.reshape(M, N).astype(io_dtype)],
        axis=-1,
    )

    # row tile: multiple of sublane packing (8 for 4-byte dtypes, 16 for bf16)
    sub = 8 if jnp.dtype(io_dtype).itemsize == 4 else 16
    TM = min(int(row_tile), _round_up(M, sub))
    TM = _round_up(TM, sub)
    M_pad = _round_up(M, TM)
    if M_pad != M:
        xc = jnp.pad(xc, ((0, M_pad - M), (0, 0)))

    grid = (M_pad // TM,)

    out = pl.pallas_call(
        _mlpbase_fused_kernel,
        out_shape=jax.ShapeDtypeStruct((M_pad, 2 * H), io_dtype),
        grid=grid,
        in_specs=[
            # streamed activations (pipelined over the row grid)
            pl.BlockSpec((TM, Kin), lambda i: (i, 0)),
            # tiny fused weights/biases: constant index_map -> stay resident
            pl.BlockSpec((Kin, 2 * H), lambda i: (0, 0)),
            pl.BlockSpec((1, 2 * H), lambda i: (0, 0)),
            pl.BlockSpec((2 * H, 2 * H), lambda i: (0, 0)),
            pl.BlockSpec((1, 2 * H), lambda i: (0, 0)),
            pl.BlockSpec((2 * H, 2 * H), lambda i: (0, 0)),
            pl.BlockSpec((1, 2 * H), lambda i: (0, 0)),
        ],
        out_specs=pl.BlockSpec((TM, 2 * H), lambda i: (i, 0)),
        compiler_params=pltpu.CompilerParams(
            dimension_semantics=("parallel",),   # v7x: shard rows across both TCs
            vmem_limit_bytes=32 * 1024 * 1024,
        ),
    )(xc, fused["w1"], fused["b1"], fused["w2"], fused["b2"],
      fused["wout"], fused["bout"])

    hidden_actor = out[:M, :H].reshape(S, B, H)
    value = out[:M, H:H + 1].reshape(S, B, 1)
    return value, hidden_actor, rnn_hxs


# ------------------------- parameter construction --------------------------

def _orthogonal(key, out_dim, in_dim, gain):
    # PyTorch nn.init.orthogonal_ on a [out, in] weight, transposed to
    # [in, out] so that forward is x @ W.
    w = jax.nn.initializers.orthogonal(scale=gain)(key, (out_dim, in_dim), jnp.float32)
    return jnp.transpose(w)


def init_params(key, num_inputs, cond_size, hidden_size):
    """Raw MLPBase parameters in [in, out] layout (matches the PyTorch module)."""
    gain = float(np.sqrt(2.0))
    ks = jax.random.split(key, 5)
    return {
        "wc1": _orthogonal(ks[0], hidden_size, num_inputs, gain),
        "bc1": jnp.zeros((1, hidden_size), jnp.float32),
        "wc2": _orthogonal(ks[1], hidden_size, hidden_size, gain),
        "bc2": jnp.zeros((1, hidden_size), jnp.float32),
        "wa1": _orthogonal(ks[2], hidden_size, cond_size + num_inputs, gain),
        "ba1": jnp.zeros((1, hidden_size), jnp.float32),
        "wa2": _orthogonal(ks[3], hidden_size, hidden_size, gain),
        "ba2": jnp.zeros((1, hidden_size), jnp.float32),
        "wv": _orthogonal(ks[4], 1, hidden_size, gain),
        "bv": jnp.zeros((1, 1), jnp.float32),
    }


def fuse_params(raw, num_inputs, cond_size, hidden_size):
    """Merge critic/actor towers into the fused kernel weights. Done ONCE."""
    N, C, H = num_inputs, cond_size, hidden_size
    wa1 = raw["wa1"]                      # [C+N, H]; rows 0:C act on cond, C: on x
    w1 = jnp.zeros((C + N, 2 * H), jnp.float32)
    w1 = w1.at[:C, :H].set(wa1[:C])       # actor: cond part
    w1 = w1.at[C:, :H].set(wa1[C:])       # actor: x part
    w1 = w1.at[C:, H:].set(raw["wc1"])    # critic: x only (cond rows stay zero)
    b1 = jnp.concatenate([raw["ba1"], raw["bc1"]], axis=-1)

    w2 = jnp.zeros((2 * H, 2 * H), jnp.float32)
    w2 = w2.at[:H, :H].set(raw["wa2"])
    w2 = w2.at[H:, H:].set(raw["wc2"])
    b2 = jnp.concatenate([raw["ba2"], raw["bc2"]], axis=-1)

    wout = jnp.zeros((2 * H, 2 * H), jnp.float32)
    wout = wout.at[:H, :H].set(jnp.eye(H, dtype=jnp.float32))   # actor passthrough
    wout = wout.at[H:, H].set(raw["wv"][:, 0])                  # value head at lane H
    bout = jnp.zeros((1, 2 * H), jnp.float32)
    bout = bout.at[0, H].set(raw["bv"][0, 0])

    return {"w1": w1, "b1": b1, "w2": w2, "b2": b2,
            "wout": wout, "bout": bout, "H": H}


# ------------------------------ reference ----------------------------------

def _reference(inputs, rnn_hxs, condition_state, raw):
    x = inputs.astype(jnp.float32)
    c = condition_state.astype(jnp.float32)
    hc = jnp.tanh(x @ raw["wc1"] + raw["bc1"])
    hc = jnp.tanh(hc @ raw["wc2"] + raw["bc2"])
    cat = jnp.concatenate([c, x], axis=-1)
    ha = jnp.tanh(cat @ raw["wa1"] + raw["ba1"])
    ha = jnp.tanh(ha @ raw["wa2"] + raw["ba2"])
    value = hc @ raw["wv"] + raw["bv"]
    return value, ha, rnn_hxs


if __name__ == "__main__":
    seq_len, batch = 3, 5
    num_inputs, cond_size, hidden_size = 12, 6, 64

    key = jax.random.PRNGKey(0)
    kx, kc, kh, kp = jax.random.split(key, 4)

    inputs = jax.random.normal(kx, (seq_len, batch, num_inputs), jnp.float32)
    condition_state = jax.random.normal(kc, (seq_len, batch, cond_size), jnp.float32)
    rnn_hxs = jax.random.normal(kh, (batch, hidden_size), jnp.float32)

    raw = init_params(kp, num_inputs, cond_size, hidden_size)
    fused = fuse_params(raw, num_inputs, cond_size, hidden_size)
    v_ref, a_ref, _ = _reference(inputs, rnn_hxs, condition_state, raw)

    # (1) f32 I/O, default row tile (single grid step at this small M)
    value, hidden_actor, out_hxs = mlpbase_forward(
        inputs, rnn_hxs, condition_state, fused)
    jax.block_until_ready((value, hidden_actor, out_hxs))
    np.testing.assert_allclose(np.asarray(value), np.asarray(v_ref), rtol=1e-5, atol=1e-5)
    np.testing.assert_allclose(np.asarray(hidden_actor), np.asarray(a_ref), rtol=1e-5, atol=1e-5)

    # (2) tiny row tile to exercise multi-step grid + row padding path
    value2, actor2, _ = mlpbase_forward(
        inputs, rnn_hxs, condition_state, fused, row_tile=8)
    jax.block_until_ready((value2, actor2))
    np.testing.assert_allclose(np.asarray(value2), np.asarray(v_ref), rtol=1e-5, atol=1e-5)
    np.testing.assert_allclose(np.asarray(actor2), np.asarray(a_ref), rtol=1e-5, atol=1e-5)

    # (3) bf16 I/O path (recommended on v6e/v7x for the memory-bound streams)
    value3, actor3, _ = mlpbase_forward(
        inputs, rnn_hxs, condition_state, fused, io_dtype=jnp.bfloat16)
    jax.block_until_ready((value3, actor3))
    np.testing.assert_allclose(np.asarray(value3.astype(jnp.float32)),
                               np.asarray(v_ref), rtol=0.1, atol=0.1)
    np.testing.assert_allclose(np.asarray(actor3.astype(jnp.float32)),
                               np.asarray(a_ref), rtol=0.1, atol=0.1)

    assert value.shape == (seq_len, batch, 1)
    assert hidden_actor.shape == (seq_len, batch, hidden_size)
    assert out_hxs.shape == (batch, hidden_size)

    print("KERNEL_OK")
</pallas_src>

<mosaic_0001>
module attributes {stable_mosaic.version = 11 : i64} {
  func.func @_mlpbase_fused_kernel(%arg0: i32, %arg1: memref<16x18xf32, #tpu.memory_space<vmem>>, %arg2: memref<18x128xf32, #tpu.memory_space<vmem>>, %arg3: memref<1x128xf32, #tpu.memory_space<vmem>>, %arg4: memref<128x128xf32, #tpu.memory_space<vmem>>, %arg5: memref<1x128xf32, #tpu.memory_space<vmem>>, %arg6: memref<128x128xf32, #tpu.memory_space<vmem>>, %arg7: memref<1x128xf32, #tpu.memory_space<vmem>>, %arg8: memref<16x128xf32, #tpu.memory_space<vmem>>) attributes {dimension_semantics = [#tpu.dimension_semantics<parallel>], iteration_bounds = array<i64: 1>, scalar_prefetch = 0 : i64, scratch_operands = 0 : i64, tpu.core_type = #tpu.core_type<tc>, window_params = [{transform_indices = @transform_0, window_bounds = array<i64: 16, 18>}, {pipeline_mode = #tpu.pipeline_mode<synchronous>, transform_indices = @transform_1, window_bounds = array<i64: 18, 128>}, {pipeline_mode = #tpu.pipeline_mode<synchronous>, transform_indices = @transform_2, window_bounds = array<i64: 1, 128>}, {pipeline_mode = #tpu.pipeline_mode<synchronous>, transform_indices = @transform_3, window_bounds = array<i64: 128, 128>}, {pipeline_mode = #tpu.pipeline_mode<synchronous>, transform_indices = @transform_4, window_bounds = array<i64: 1, 128>}, {pipeline_mode = #tpu.pipeline_mode<synchronous>, transform_indices = @transform_5, window_bounds = array<i64: 128, 128>}, {pipeline_mode = #tpu.pipeline_mode<synchronous>, transform_indices = @transform_6, window_bounds = array<i64: 1, 128>}, {transform_indices = @transform_7, window_bounds = array<i64: 16, 128>}]} {
    %c0 = arith.constant 0 : index
    %c0_0 = arith.constant 0 : index
    %0 = vector.load %arg1[%c0, %c0_0] : memref<16x18xf32, #tpu.memory_space<vmem>>, vector<16x18xf32>
    %c0_1 = arith.constant 0 : index
    %c0_2 = arith.constant 0 : index
    %1 = vector.load %arg2[%c0_1, %c0_2] : memref<18x128xf32, #tpu.memory_space<vmem>>, vector<18x128xf32>
    %cst = arith.constant dense<0.000000e+00> : vector<16x128xf32>
    %2 = tpu.matmul %0, %1, %cst {dimension_numbers = #tpu.dot_dimension_numbers<[1], [0], [0], [1], [0, 0, 1, 1], [], []>} : vector<16x18xf32>, vector<18x128xf32>, vector<16x128xf32> -> vector<16x128xf32>
    %c0_3 = arith.constant 0 : index
    %c0_4 = arith.constant 0 : index
    %3 = vector.load %arg3[%c0_3, %c0_4] : memref<1x128xf32, #tpu.memory_space<vmem>>, vector<1x128xf32>
    %4 = vector.broadcast %3 : vector<1x128xf32> to vector<16x128xf32>
    %5 = arith.addf %2, %4 : vector<16x128xf32>
    %6 = math.tanh %5 : vector<16x128xf32>
    %c0_5 = arith.constant 0 : index
    %c0_6 = arith.constant 0 : index
    %7 = vector.load %arg4[%c0_5, %c0_6] : memref<128x128xf32, #tpu.memory_space<vmem>>, vector<128x128xf32>
    %cst_7 = arith.constant dense<0.000000e+00> : vector<16x128xf32>
    %8 = tpu.matmul %6, %7, %cst_7 {dimension_numbers = #tpu.dot_dimension_numbers<[1], [0], [0], [1], [0, 0, 1, 1], [], []>} : vector<16x128xf32>, vector<128x128xf32>, vector<16x128xf32> -> vector<16x128xf32>
    %c0_8 = arith.constant 0 : index
    %c0_9 = arith.constant 0 : index
    %9 = vector.load %arg5[%c0_8, %c0_9] : memref<1x128xf32, #tpu.memory_space<vmem>>, vector<1x128xf32>
    %10 = vector.broadcast %9 : vector<1x128xf32> to vector<16x128xf32>
    %11 = arith.addf %8, %10 : vector<16x128xf32>
    %12 = math.tanh %11 : vector<16x128xf32>
    %c0_10 = arith.constant 0 : index
    %c0_11 = arith.constant 0 : index
    %13 = vector.load %arg6[%c0_10, %c0_11] : memref<128x128xf32, #tpu.memory_space<vmem>>, vector<128x128xf32>
    %cst_12 = arith.constant dense<0.000000e+00> : vector<16x128xf32>
    %14 = tpu.matmul %12, %13, %cst_12 {dimension_numbers = #tpu.dot_dimension_numbers<[1], [0], [0], [1], [0, 0, 1, 1], [], []>} : vector<16x128xf32>, vector<128x128xf32>, vector<16x128xf32> -> vector<16x128xf32>
    %c0_13 = arith.constant 0 : index
    %c0_14 = arith.constant 0 : index
    %15 = vector.load %arg7[%c0_13, %c0_14] : memref<1x128xf32, #tpu.memory_space<vmem>>, vector<1x128xf32>
    %16 = vector.broadcast %15 : vector<1x128xf32> to vector<16x128xf32>
    %17 = arith.addf %14, %16 : vector<16x128xf32>
    %c0_15 = arith.constant 0 : index
    %c0_16 = arith.constant 0 : index
    %18 = vector.load %arg8[%c0_15, %c0_16] : memref<16x128xf32, #tpu.memory_space<vmem>>, vector<16x128xf32>
    tpu.vector_store %arg8[%c0_15, %c0_16], %17 {strides = array<i32>} : memref<16x128xf32, #tpu.memory_space<vmem>>, vector<16x128xf32>,
    return
  }
  func.func @transform_0(%arg0: i32) -> (i32, i32) {
    %c0_i32 = arith.constant 0 : i32
    %c0_i32_0 = arith.constant 0 : i32
    return %arg0, %c0_i32 : i32, i32
  }
  func.func @transform_1(%arg0: i32) -> (i32, i32) {
    %c0_i32 = arith.constant 0 : i32
    %c0_i32_0 = arith.constant 0 : i32
    %c0_i32_1 = arith.constant 0 : i32
    return %c0_i32, %c0_i32_0 : i32, i32
  }
  func.func @transform_2(%arg0: i32) -> (i32, i32) {
    %c0_i32 = arith.constant 0 : i32
    %c0_i32_0 = arith.constant 0 : i32
    %c0_i32_1 = arith.constant 0 : i32
    return %c0_i32, %c0_i32_0 : i32, i32
  }
  func.func @transform_3(%arg0: i32) -> (i32, i32) {
    %c0_i32 = arith.constant 0 : i32
    %c0_i32_0 = arith.constant 0 : i32
    %c0_i32_1 = arith.constant 0 : i32
    return %c0_i32, %c0_i32_0 : i32, i32
  }
  func.func @transform_4(%arg0: i32) -> (i32, i32) {
    %c0_i32 = arith.constant 0 : i32
    %c0_i32_0 = arith.constant 0 : i32
    %c0_i32_1 = arith.constant 0 : i32
    return %c0_i32, %c0_i32_0 : i32, i32
  }
  func.func @transform_5(%arg0: i32) -> (i32, i32) {
    %c0_i32 = arith.constant 0 : i32
    %c0_i32_0 = arith.constant 0 : i32
    %c0_i32_1 = arith.constant 0 : i32
    return %c0_i32, %c0_i32_0 : i32, i32
  }
  func.func @transform_6(%arg0: i32) -> (i32, i32) {
    %c0_i32 = arith.constant 0 : i32
    %c0_i32_0 = arith.constant 0 : i32
    %c0_i32_1 = arith.constant 0 : i32
    return %c0_i32, %c0_i32_0 : i32, i32
  }
  func.func @transform_7(%arg0: i32) -> (i32, i32) {
    %c0_i32 = arith.constant 0 : i32
    %c0_i32_0 = arith.constant 0 : i32
    return %arg0, %c0_i32 : i32, i32
  }
}

</mosaic_0001>

<bundles_post_ra>
// kernel: tpu_custom_call.1
= control target key start
LH: loop header
LB: loop body
LE: loop exit
PB: predicated region body
PF: predicated region fallthrough
CT: control target
= control target key end

     0   :  { %12 = vsyncpa [#allocation3], 0  ;;  %s877_s0 = inlined_call_operand.hbm [shape: f32[16,18], index: 0, kind: input, shape index: {}]   ;;  %s878_s1 = inlined_call_operand.hbm [shape: f32[18,128], index: 1, kind: input, shape index: {}]   ;;  %s879_s2 = inlined_call_operand.vmem [shape: f32[1,128], index: 2, kind: input, shape index: {}]   ;;  %s880_s3 = inlined_call_operand.hbm [shape: f32[128,128], index: 3, kind: input, shape index: {}]   ;;  %s881_s4 = inlined_call_operand.vmem [shape: f32[1,128], index: 4, kind: input, shape index: {}]   ;;  %s882_s5 = inlined_call_operand.hbm [shape: f32[128,128], index: 5, kind: input, shape index: {}]   ;;  %s883_s6 = inlined_call_operand.vmem [shape: f32[1,128], index: 6, kind: input, shape index: {}]   ;;  %s884_s7 = inlined_call_operand.hbm [shape: f32[16,128], index: 7, kind: output, shape index: {}]  }
   0x1   :  { %13 = vsyncpa [#allocation6], 0 }
   0x2   :  { %14 = vsyncpa [#allocation9], 0 }
   0x3   :  { %15 = vsyncpa [#allocation4], 0  ;;  %s728_s24 = smov [#allocation5]   ;;  %s729_s26 = smov [#allocation2]  }
   0x4   :  { %s33_s25 = sshll.u32 %s728_s24, 4  ;;  %s21_s27 = sshll.u32 %s729_s26, 4  ;;  %s34_s25 = int_to_ptr.vmem [resolvable:$true] %s33_s25  ;;  %s775_s27 = int_to_ptr.vmem [resolvable:$true] %s21_s27 }
   0x5   :  { %s610_s30 = scalar_lea.hbm %s878_s1, 384 }
   0x6   :  { %p611_p0 = scmp.ne.s32.totalorder %s878_s1, %s610_s30  ;;  %p614_p1 = scmp.lt.u32.totalorder %s610_s30, %s878_s1 }
   0x8   :  { %p616_p2 = pnand %p614_p1, %p611_p0 }
   0xa   :  { %619 = shalt.err (!%p616_p2)
}
   0xb   :  { %s620_s12 = scalar_lea.vmem %s34_s25, 384  ;;  %p625_p4 = scmp.lt.s32.totalorder %s34_s25, %s34_s25 }
   0xc   :  { %p621_p3 = scmp.ne.s32.totalorder %s34_s25, %s620_s12  ;;  %p626_p5 = scmp.lt.s32.totalorder %s620_s12, %s620_s12 }
   0xe   :  { %p627_p6 = por %p626_p5, %p625_p4 }
  0x10   :  { %p628_p7 = pnand %p627_p6, %p621_p3 }
  0x12   :  { %631 = shalt.err (!%p628_p7)
}
  0x13   :  { %s730_s13 = smov 128   ;;  %s731_s14 = smov 8  }
  0x14   :  { %39 = dma.hbm_to_vmem [thread:$0]  %s878_s1, 384, %s34_s25, [#allocation6], %s730_s13, %s730_s13, %s731_s14  }
  0x15   :  { %s632_s19 = scalar_lea.hbm %s877_s0, 256 }
  0x16   :  { %p633_p8 = scmp.ne.s32.totalorder %s877_s0, %s632_s19  ;;  %p636_p9 = scmp.lt.u32.totalorder %s632_s19, %s877_s0 }
  0x18   :  { %p638_p10 = pnand %p636_p9, %p633_p8 }
  0x1a   :  { %641 = shalt.err (!%p638_p10)
}
  0x1b   :  { %s642_s24 = scalar_lea.vmem %s775_s27, 256  ;;  %p647_p12 = scmp.lt.s32.totalorder %s775_s27, %s775_s27 }
  0x1c   :  { %p643_p11 = scmp.ne.s32.totalorder %s775_s27, %s642_s24  ;;  %p648_p13 = scmp.lt.s32.totalorder %s642_s24, %s642_s24 }
  0x1e   :  { %p649_p0 = por %p648_p13, %p647_p12 }
  0x20   :  { %p650_p1 = pnand %p649_p0, %p643_p11 }
  0x22   :  { %653 = shalt.err (!%p650_p1)
}
  0x23   :  { %27 = dma.hbm_to_vmem [thread:$0]  %s877_s0, 256, %s775_s27, [#allocation3], %s730_s13, %s730_s13, %s731_s14  }
  0x24   :  { %s732_s26 = smov [#allocation7]   ;;  %s733_s29 = smov [#allocation8]  }
  0x25   :  { %s47_s28 = sshll.u32 %s732_s26, 4  ;;  %s61_s30 = sshll.u32 %s733_s29, 4  ;;  %s48_s28 = int_to_ptr.vmem [resolvable:$true] %s47_s28  ;;  %s812_s30 = int_to_ptr.vmem [resolvable:$true] %s61_s30 }
  0x26   :  { %s654_s10 = scalar_lea.hbm %s880_s3, 2048 }
  0x27   :  { %p655_p2 = scmp.ne.s32.totalorder %s880_s3, %s654_s10  ;;  %p658_p3 = scmp.lt.u32.totalorder %s654_s10, %s880_s3 }
  0x29   :  { %p660_p4 = pnand %p658_p3, %p655_p2 }
  0x2b   :  { %663 = shalt.err (!%p660_p4)
}
  0x2c   :  { %s664_s0 = scalar_lea.vmem %s48_s28, 2048  ;;  %p669_p6 = scmp.lt.s32.totalorder %s48_s28, %s48_s28 }
  0x2d   :  { %p665_p5 = scmp.ne.s32.totalorder %s48_s28, %s664_s0  ;;  %p670_p7 = scmp.lt.s32.totalorder %s664_s0, %s664_s0 }
  0x2f   :  { %p671_p8 = por %p670_p7, %p669_p6 }
  0x31   :  { %p672_p9 = pnand %p671_p8, %p665_p5 }
  0x33   :  { %675 = shalt.err (!%p672_p9)
}
  0x34   :  { %53 = dma.hbm_to_vmem [thread:$0]  %s880_s3, 2048, %s48_s28, [#allocation6], %s730_s13, %s730_s13, %s731_s14  }
  0x35   :  { %s676_s20 = scalar_lea.hbm %s882_s5, 2048 }
  0x36   :  { %p677_p10 = scmp.ne.s32.totalorder %s882_s5, %s676_s20  ;;  %p680_p11 = scmp.lt.u32.totalorder %s676_s20, %s882_s5 }
  0x38   :  { %p682_p12 = pnand %p680_p11, %p677_p10 }
  0x3a   :  { %685 = shalt.err (!%p682_p12)
}
  0x3b   :  { %s686_s1 = scalar_lea.vmem %s812_s30, 2048  ;;  %p691_p0 = scmp.lt.s32.totalorder %s812_s30, %s812_s30 }
  0x3c   :  { %p687_p13 = scmp.ne.s32.totalorder %s812_s30, %s686_s1  ;;  %p692_p1 = scmp.lt.s32.totalorder %s686_s1, %s686_s1 }
  0x3e   :  { %p693_p2 = por %p692_p1, %p691_p0 }
  0x40   :  { %p694_p3 = pnand %p693_p2, %p687_p13 }
  0x42   :  { %697 = shalt.err (!%p694_p3)
}
  0x43   :  { %67 = dma.hbm_to_vmem [thread:$0]  %s882_s5, 2048, %s812_s30, [#allocation9], %s730_s13, %s730_s13, %s731_s14  }
  0x44   :  { %720 = dma.done.wait [#allocation3], 256  }
  0x45   :  { %721 = vsyncadd [#allocation3], 4294967040 }
  0x46   :  { %722 = dma.done.wait [#allocation6], 2432  }
  0x47   :  { %723 = vsyncadd [#allocation6], 4294964864 }
  0x48   :  { %724 = dma.done.wait [#allocation9], 2048  }
  0x49   :  { %725 = vsyncadd [#allocation9], 4294965248  ;;  %vm94_vm0 = vcmask 146432   ;;  %v84_v0 = vld [vmem:[#allocation5] sm:$0xff]  ;;  %v85_v1 = vld [vmem:[#allocation5 + $0x8] sm:$0xff]  ;;  %vm101_vm1 = vcmask 1041408  }
  0x4a   :  { %v527_v2 = vpack.c.bf16 %v85_v1, %v84_v0  ;;  %v86_v3 = vld [vmem:[#allocation5 + $0x10] sm:$0x3]  ;;  %v182_v5 = vld [vmem:[#allocation7] sm:$0xff]  ;;  %v183_v6 = vld [vmem:[#allocation7 + $0x8] sm:$0xff]  ;;  %s734_s8 = smov [#allocation10]  }
  0x4b   :  { %v82_v4 = vld [vmem:[#allocation2] sm:$0xff]  ;;  %v184_v7 = vld [vmem:[#allocation7 + $0x10] sm:$0xff]  ;;  %v531_v9 = vpack.c.bf16 %v183_v6, %v182_v5  ;;  %v186_v11 = vld [vmem:[#allocation7 + $0x20] sm:$0xff]  ;;  %s387_s9 = sshll.u32 %s734_s8, 4  ;;  %s388_s9 = int_to_ptr.vmem [resolvable:$true] %s387_s9 }
  0x4c   :  { %454 = vmatprep.mubr.msk.f32.mxu0 %vm94_vm0, %v82_v4  ;;  %v185_v8 = vld [vmem:[#allocation7 + $0x18] sm:$0xff]  ;;  %528 = vmatprep.subr.bf16.mxu0 %v527_v2  ;;  %v187_v12 = vld [vmem:[#allocation7 + $0x28] sm:$0xff]  ;;  %v83_v13 = vld [vmem:[#allocation2 + $0x8] sm:$0xff]  ;;  %p703_p5 = scmp.lt.s32.totalorder %s388_s9, %s388_s9 }
  0x4d   :  { %v535_v10 = vpack.c.bf16 %v185_v8, %v184_v7  ;;  %530 = vmatpush3.bf16.msra.mxu0 %v527_v2  ;;  %532 = vmatprep.subr.bf16.mxu1 %v531_v9  ;;  %v539_v14 = vpack.c.bf16 %v187_v12, %v186_v11  ;;  %v188_v15 = vld [vmem:[#allocation7 + $0x30] sm:$0xff]  ;;  %v189_v16 = vld [vmem:[#allocation7 + $0x38] sm:$0xff]  ;;  %v190_v18 = vld [vmem:[#allocation7 + $0x40] sm:$0xff] }
  0x4e   :  { %452 = vmatprep.subr.msk.mxu0 %vm101_vm1, %v86_v3  ;;  %534 = vmatpush3.bf16.msra.mxu1 %v531_v9  ;;  %v543_v17 = vpack.c.bf16 %v189_v16, %v188_v15  ;;  %v191_v19 = vld [vmem:[#allocation7 + $0x48] sm:$0xff]  ;;  %v192_v21 = vld [vmem:[#allocation7 + $0x50] sm:$0xff]  ;;  %v193_v22 = vld [vmem:[#allocation7 + $0x58] sm:$0xff] }
  0x4f   :  { %536 = vmatprep.subr.bf16.mxu1 %v535_v10  ;;  %v547_v20 = vpack.c.bf16 %v191_v19, %v190_v18  ;;  %v551_v23 = vpack.c.bf16 %v193_v22, %v192_v21  ;;  %v194_v24 = vld [vmem:[#allocation7 + $0x60] sm:$0xff]  ;;  %v195_v25 = vld [vmem:[#allocation7 + $0x68] sm:$0xff]  ;;  %v196_v26 = vld [vmem:[#allocation7 + $0x70] sm:$0xff] }
  0x50   :  { %v555_v27 = vpack.c.bf16 %v195_v25, %v194_v24  ;;  %v197_v28 = vld [vmem:[#allocation7 + $0x78] sm:$0xff]  ;;  %v282_v30 = vld [vmem:[#allocation8] sm:$0xff]  ;;  %v283_v31 = vld [vmem:[#allocation8 + $0x8] sm:$0xff] }
  0x51   :  { %453 = vmatpush3.msk.msra.mxu0 %vm101_vm1, %v86_v3  ;;  %v559_v29 = vpack.c.bf16 %v197_v28, %v196_v26  ;;  %v284_v32 = vld [vmem:[#allocation8 + $0x10] sm:$0xff]  ;;  %v563_v33 = vpack.c.bf16 %v283_v31, %v282_v30  ;;  %v285_v34 = vld [vmem:[#allocation8 + $0x18] sm:$0xff]  ;;  %v286_v36 = vld [vmem:[#allocation8 + $0x20] sm:$0xff] }
  0x52   :  { %455 = vmatmul.mubr.msk.f32.vlgmr.msra.gmra.mrb[0].mxu0 %vm94_vm0, %v83_v13  ;;  %538 = vmatpush3.bf16.msra.mxu1 %v535_v10  ;;  %v567_v35 = vpack.c.bf16 %v285_v34, %v284_v32  ;;  %v287_v37 = vld [vmem:[#allocation8 + $0x28] sm:$0xff]  ;;  %v288_v39 = vld [vmem:[#allocation8 + $0x30] sm:$0xff]  ;;  %v289_v40 = vld [vmem:[#allocation8 + $0x38] sm:$0xff] }
  0x53   :  { %540 = vmatprep.subr.bf16.mxu1 %v539_v14  ;;  %564 = vmatprep.subr.bf16.mxu0 %v563_v33  ;;  %v571_v38 = vpack.c.bf16 %v287_v37, %v286_v36  ;;  %v575_v41 = vpack.c.bf16 %v289_v40, %v288_v39  ;;  %v401_v42 = vld [vmem:[%s879_s2] ss:$0 sm:$0xff]  ;;  %v290_v49 = vld [vmem:[#allocation8 + $0x40] sm:$0xff]  ;;  %v291_v50 = vld [vmem:[#allocation8 + $0x48] sm:$0xff] }
  0x54   :  { %566 = vmatpush3.bf16.msra.mxu0 %v563_v33  ;;  %v579_v51 = vpack.c.bf16 %v291_v50, %v290_v49  ;;  %v292_v52 = vld [vmem:[#allocation8 + $0x50] sm:$0xff]  ;;  %v293_v53 = vld [vmem:[#allocation8 + $0x58] sm:$0xff]  ;;  %v294_v55 = vld [vmem:[#allocation8 + $0x60] sm:$0xff] }
  0x55   :  { %568 = vmatprep.subr.bf16.mxu0 %v567_v35  ;;  %v583_v54 = vpack.c.bf16 %v293_v53, %v292_v52  ;;  %v295_v56 = vld [vmem:[#allocation8 + $0x68] sm:$0xff]  ;;  %v296_v57 = vld [vmem:[#allocation8 + $0x70] sm:$0xff]  ;;  %v297_v59 = vld [vmem:[#allocation8 + $0x78] sm:$0xff] }
  0x56   :  { %542 = vmatpush3.bf16.msra.mxu1 %v539_v14  ;;  %v587_v58 = vpack.c.bf16 %v295_v56, %v294_v55  ;;  %v591_v60 = vpack.c.bf16 %v297_v59, %v296_v57  ;;  %v405_v61 = vld [vmem:[%s881_s4] ss:$0 sm:$0xff]  ;;  %s698_s4 = scalar_lea.vmem %s388_s9, 256 }
  0x57   :  { %544 = vmatprep.subr.bf16.mxu1 %v543_v17  ;;  %v406_v4 = vld [vmem:[%s883_s6] ss:$0 sm:$0xff]  ;;  %p699_p4 = scmp.ne.s32.totalorder %s388_s9, %s698_s4  ;;  %p704_p6 = scmp.lt.s32.totalorder %s698_s4, %s698_s4 }
  0x58   :  { %570 = vmatpush3.bf16.msra.mxu0 %v567_v35 }
  0x59   :  { %572 = vmatprep.subr.bf16.mxu0 %v571_v38  ;;  %p705_p7 = por %p704_p6, %p703_p5 }
  0x5a   :  { %546 = vmatpush3.bf16.msra.mxu1 %v543_v17 }
  0x5b   :  { %548 = vmatprep.subr.bf16.mxu1 %v547_v20  ;;  %p706_p8 = pnand %p705_p7, %p699_p4 }
  0x5c   :  { %574 = vmatpush3.bf16.msra.mxu0 %v571_v38 }
  0x5d   :  { %576 = vmatprep.subr.bf16.mxu0 %v575_v41 }
  0x5e   :  { %550 = vmatpush3.bf16.msra.mxu1 %v547_v20 }
  0x5f   :  { %552 = vmatprep.subr.bf16.mxu1 %v551_v23 }
  0x60   :  { %578 = vmatpush3.bf16.msra.mxu0 %v575_v41 }
  0x61   :  { %580 = vmatprep.subr.bf16.mxu0 %v579_v51 }
  0x62   :  { %554 = vmatpush3.bf16.msra.mxu1 %v551_v23 }
  0x63   :  { %556 = vmatprep.subr.bf16.mxu1 %v555_v27 }
  0x64   :  { %582 = vmatpush3.bf16.msra.mxu0 %v579_v51 }
  0x65   :  { %584 = vmatprep.subr.bf16.mxu0 %v583_v54 }
  0x66   :  { %558 = vmatpush3.bf16.msra.mxu1 %v555_v27 }
  0x67   :  { %560 = vmatprep.subr.bf16.mxu1 %v559_v29 }
  0x68   :  { %586 = vmatpush3.bf16.msra.mxu0 %v583_v54 }
  0x69   :  { %588 = vmatprep.subr.bf16.mxu0 %v587_v58 }
  0x6a   :  { %562 = vmatpush3.bf16.msra.mxu1 %v559_v29 }
  0x6c   :  { %590 = vmatpush3.bf16.msra.mxu0 %v587_v58 }
  0x6d   :  { %592 = vmatprep.subr.bf16.mxu0 %v591_v60 }
  0x70   :  { %594 = vmatpush3.bf16.msra.mxu0 %v591_v60 }
 0x125   :  { %v456_v43 = vpop.f32.mrb[0].mxu0 }
 0x126   :  { %v177_v44 = vadd.f32 %v456_v43, %v401_v42  ;;  %v171_v45 = vpop.f32.mrb[1].mxu0 }
 0x127   :  { %v172_v46 = vadd.f32 %v401_v42, %v171_v45 }
 0x129   :  { %602 = vtanh.f32 %v172_v46 }
 0x12a   :  { %604 = vtanh.f32 %v177_v44 }
 0x133   :  { %v603_v47 = vpop.eup %602 }
 0x134   :  { %v605_v48 = vpop.eup %604  ;;  %489 = vmatprep.mubr.f32.mxu1 %v603_v47 }
 0x135   :  { %490 = vmatmul.mubr.f32.vlgmr.msra.gmra.mrb[0].mxu1 %v605_v48 }
 0x208   :  { %v491_v62 = vpop.f32.mrb[0].mxu1 }
 0x209   :  { %v277_v63 = vadd.f32 %v491_v62, %v405_v61  ;;  %v271_v0 = vpop.f32.mrb[1].mxu1 }
 0x20a   :  { %v272_v1 = vadd.f32 %v405_v61, %v271_v0 }
 0x20c   :  { %606 = vtanh.f32 %v272_v1 }
 0x20d   :  { %608 = vtanh.f32 %v277_v63 }
 0x216   :  { %v607_v2 = vpop.eup %606 }
 0x217   :  { %v609_v3 = vpop.eup %608  ;;  %524 = vmatprep.mubr.f32.mxu0 %v607_v2 }
 0x218   :  { %525 = vmatmul.mubr.f32.vlgmr.msra.gmra.mrb[2].mxu0 %v609_v3 }
 0x2eb   :  { %v526_v5 = vpop.f32.mrb[2].mxu0 }
 0x2ec   :  { %v377_v6 = vadd.f32 %v526_v5, %v406_v4  ;;  %v371_v7 = vpop.f32.mrb[3].mxu0 }
 0x2ed   :  { %v372_v8 = vadd.f32 %v406_v4, %v371_v7 }
 0x2ee   :  { %381 = vst [vmem:[#allocation10 + $0x8] sm:$0xff] %v377_v6 }
 0x2ef   :  { %380 = vst [vmem:[#allocation10] sm:$0xff] %v372_v8 }
 0x2f0   :  { %709 = shalt.err (!%p706_p8)
}
 0x2f1   :  { %s710_s6 = scalar_lea.hbm %s884_s7, 256 }
 0x2f2   :  { %p711_p9 = scmp.ne.s32.totalorder %s884_s7, %s710_s6  ;;  %p714_p10 = scmp.lt.u32.totalorder %s710_s6, %s884_s7 }
 0x2f4   :  { %p716_p11 = pnand %p714_p10, %p711_p9 }
 0x2f6   :  { %719 = shalt.err (!%p716_p11)
}
 0x2f7   :  { %393 = dma.vmem_to_hbm [thread:$0]  %s388_s9, 256, %s884_s7, [#allocation4], %s730_s13, %s730_s13, %s731_s14  }
 0x2f8   :  { %726 = dma.done.wait [#allocation4], 256  }
 0x2f9   :  { %727 = vsyncadd [#allocation4], 4294967040 }
 0x2fa   :  { %397 = vsyncpa [#allocation3], 1 }
 0x2fb   :  { %398 = vsyncpa [#allocation6], 1 }
 0x2fc   :  { %399 = vsyncpa [#allocation9], 1 }
 0x2fd   :  { %400 = vsyncpa [#allocation4], 1 }

</bundles_post_ra>
